<compile_context>
chip_gen: v6e
topology: v6e:2x2x1
jax: 0.10.0
libtpu: 0.0.40
codegen_flags: <defaults>
</compile_context>

<pallas_src>
import jax
import jax.numpy as jnp
from jax.experimental import pallas as pl
from jax.experimental.pallas import tpu as pltpu


def _round_up(x, m):
    return ((x + m - 1) // m) * m


def _linear_kernel(x_ref, w_ref, b_ref, o_ref, acc_ref):
    # x_ref: [TM, TK] f32   w_ref: [TK, 2] f32   b_ref: [1, 2] f32
    # o_ref: [TM, 2]  f32   acc_ref: [TM, 2] f32 scratch (resident across K)
    k = pl.program_id(1)

    @pl.when(k == 0)
    def _():
        acc_ref[...] = jnp.zeros_like(acc_ref)

    acc_ref[...] += jnp.dot(x_ref[...], w_ref[...],
                            preferred_element_type=jnp.float32)

    @pl.when(k == pl.num_programs(1) - 1)
    def _():
        o_ref[...] = acc_ref[...] + b_ref[...]


def log_regression_forward(x_nchw, weight, bias, *, tm_max=256, tk_max=512):
    """Pallas implementation of LogRegression.forward.

    x_nchw : [B, ...] float32   (flattened from axis 1, like x.flatten(1))
    weight : [2, K]   float32   (torch Linear weight, out_features=2)
    bias   : [2]      float32
    returns: [B, 2]   float32
    """
    B = x_nchw.shape[0]
    x_flat = x_nchw.reshape(B, -1).astype(jnp.float32)   # glue: flatten(1)
    K = x_flat.shape[1]

    # Tile sizes: batch tiles sublane-aligned (8), K tiles lane-aligned (128).
    tm = min(tm_max, _round_up(B, 8))
    tk = min(tk_max, _round_up(K, 128))
    B_pad = _round_up(B, tm)
    K_pad = _round_up(K, tk)

    # Zero-pad so every tile is full; padded rows/cols contribute 0 to the dot.
    if (B_pad, K_pad) != (B, K):
        x_flat = jnp.pad(x_flat, ((0, B_pad - B), (0, K_pad - K)))
    w_t = weight.T.astype(jnp.float32)                    # [K, 2]
    if K_pad != K:
        w_t = jnp.pad(w_t, ((0, K_pad - K), (0, 0)))
    b2d = bias.reshape(1, 2).astype(jnp.float32)          # [1, 2]

    grid = (B_pad // tm, K_pad // tk)

    out = pl.pallas_call(
        _linear_kernel,
        out_shape=jax.ShapeDtypeStruct((B_pad, 2), jnp.float32),
        grid_spec=pltpu.PrefetchScalarGridSpec(
            num_scalar_prefetch=0,
            grid=grid,
            in_specs=[
                # x: streamed over (batch, K) -> auto double-buffered DMA.
                pl.BlockSpec((tm, tk), lambda i, k: (i, k)),
                # W^T: changes only along K; resident across the batch axis.
                pl.BlockSpec((tk, 2), lambda i, k: (k, 0)),
                # bias: constant block index -> stays resident in VMEM.
                pl.BlockSpec((1, 2), lambda i, k: (0, 0)),
            ],
            # Output block index constant along K -> acts as the accumulator
            # destination, only written on the final K step.
            out_specs=pl.BlockSpec((tm, 2), lambda i, k: (i, 0)),
            scratch_shapes=[pltpu.VMEM((tm, 2), jnp.float32)],
        ),
        compiler_params=pltpu.CompilerParams(
            dimension_semantics=("parallel", "arbitrary"),
        ),
    )(x_flat, w_t, b2d)

    return out[:B]


if __name__ == "__main__":
    key = jax.random.PRNGKey(0)
    kx, kw, kb = jax.random.split(key, 3)

    # Small shapes consistent with the module: input_size = C*H*W = 4*16*16 = 1024
    B, C, H, W = 2, 4, 16, 16
    input_size = C * H * W

    x = jax.random.normal(kx, (B, C, H, W), dtype=jnp.float32)
    # Deterministic parameter init (synthetic; mimics init_norm: N(0, 1))
    weight = jax.random.normal(kw, (2, input_size), dtype=jnp.float32)
    bias = jax.random.normal(kb, (2,), dtype=jnp.float32)

    out = log_regression_forward(x, weight, bias)
    jax.block_until_ready(out)

    # Reference check against plain JAX (same semantics as torch Linear)
    ref = x.reshape(B, -1) @ weight.T + bias
    assert out.shape == (B, 2)
    assert jnp.allclose(out, ref, atol=1e-4, rtol=1e-4)

    print("KERNEL_OK")
</pallas_src>

<mosaic_0001>
module attributes {stable_mosaic.version = 11 : i64} {
  func.func @_linear_kernel(%arg0: i32, %arg1: i32, %arg2: memref<8x512xf32, #tpu.memory_space<vmem>>, %arg3: memref<512x2xf32, #tpu.memory_space<vmem>>, %arg4: memref<1x2xf32, #tpu.memory_space<vmem>>, %arg5: memref<8x2xf32, #tpu.memory_space<vmem>>, %arg6: memref<8x2xf32, #tpu.memory_space<vmem>>) attributes {dimension_semantics = [#tpu.dimension_semantics<parallel>, #tpu.dimension_semantics<arbitrary>], iteration_bounds = array<i64: 1, 2>, scalar_prefetch = 0 : i64, scratch_operands = 1 : i64, tpu.core_type = #tpu.core_type<tc>, window_params = [{transform_indices = @transform_0, window_bounds = array<i64: 8, 512>}, {transform_indices = @transform_1, window_bounds = array<i64: 512, 2>}, {pipeline_mode = #tpu.pipeline_mode<synchronous>, transform_indices = @transform_2, window_bounds = array<i64: 1, 2>}, {transform_indices = @transform_3, window_bounds = array<i64: 8, 2>}]} {
    %c0_i32 = arith.constant 0 : i32
    %0 = arith.cmpi eq, %arg1, %c0_i32 : i32
    %1 = arith.extui %0 : i1 to i32
    %c0_i32_0 = arith.constant 0 : i32
    %2 = arith.cmpi ne, %1, %c0_i32_0 : i32
    scf.if %2 {
      %cst_9 = arith.constant 0.000000e+00 : f32
      %12 = vector.broadcast %cst_9 : f32 to vector<8x2xf32>
      %c0_10 = arith.constant 0 : index
      %c0_11 = arith.constant 0 : index
      %13 = vector.load %arg6[%c0_10, %c0_11] : memref<8x2xf32, #tpu.memory_space<vmem>>, vector<8x2xf32>
      tpu.vector_store %arg6[%c0_10, %c0_11], %12 {strides = array<i32>} : memref<8x2xf32, #tpu.memory_space<vmem>>, vector<8x2xf32>,
    } else {
    }
    %c0 = arith.constant 0 : index
    %c0_1 = arith.constant 0 : index
    %3 = vector.load %arg6[%c0, %c0_1] : memref<8x2xf32, #tpu.memory_space<vmem>>, vector<8x2xf32>
    %c0_2 = arith.constant 0 : index
    %c0_3 = arith.constant 0 : index
    %4 = vector.load %arg2[%c0_2, %c0_3] : memref<8x512xf32, #tpu.memory_space<vmem>>, vector<8x512xf32>
    %c0_4 = arith.constant 0 : index
    %c0_5 = arith.constant 0 : index
    %5 = vector.load %arg3[%c0_4, %c0_5] : memref<512x2xf32, #tpu.memory_space<vmem>>, vector<512x2xf32>
    %cst = arith.constant dense<0.000000e+00> : vector<8x2xf32>
    %6 = tpu.matmul %4, %5, %cst {dimension_numbers = #tpu.dot_dimension_numbers<[1], [0], [0], [1], [0, 0, 1, 1], [], []>} : vector<8x512xf32>, vector<512x2xf32>, vector<8x2xf32> -> vector<8x2xf32>
    %7 = arith.addf %3, %6 : vector<8x2xf32>
    %c0_6 = arith.constant 0 : index
    %c0_7 = arith.constant 0 : index
    %8 = vector.load %arg6[%c0_6, %c0_7] : memref<8x2xf32, #tpu.memory_space<vmem>>, vector<8x2xf32>
    tpu.vector_store %arg6[%c0_6, %c0_7], %7 {strides = array<i32>} : memref<8x2xf32, #tpu.memory_space<vmem>>, vector<8x2xf32>,
    %c1_i32 = arith.constant 1 : i32
    %9 = arith.cmpi eq, %arg1, %c1_i32 : i32
    %10 = arith.extui %9 : i1 to i32
    %c0_i32_8 = arith.constant 0 : i32
    %11 = arith.cmpi ne, %10, %c0_i32_8 : i32
    scf.if %11 {
      %c0_9 = arith.constant 0 : index
      %c0_10 = arith.constant 0 : index
      %12 = vector.load %arg6[%c0_9, %c0_10] : memref<8x2xf32, #tpu.memory_space<vmem>>, vector<8x2xf32>
      %c0_11 = arith.constant 0 : index
      %c0_12 = arith.constant 0 : index
      %13 = vector.load %arg4[%c0_11, %c0_12] : memref<1x2xf32, #tpu.memory_space<vmem>>, vector<1x2xf32>
      %14 = vector.broadcast %13 : vector<1x2xf32> to vector<8x2xf32>
      %15 = arith.addf %12, %14 : vector<8x2xf32>
      %c0_13 = arith.constant 0 : index
      %c0_14 = arith.constant 0 : index
      %16 = vector.load %arg5[%c0_13, %c0_14] : memref<8x2xf32, #tpu.memory_space<vmem>>, vector<8x2xf32>
      tpu.vector_store %arg5[%c0_13, %c0_14], %15 {strides = array<i32>} : memref<8x2xf32, #tpu.memory_space<vmem>>, vector<8x2xf32>,
    } else {
    }
    return
  }
  func.func @transform_0(%arg0: i32, %arg1: i32) -> (i32, i32) {
    %c0_i32 = arith.constant 0 : i32
    return %arg0, %arg1 : i32, i32
  }
  func.func @transform_1(%arg0: i32, %arg1: i32) -> (i32, i32) {
    %c0_i32 = arith.constant 0 : i32
    %c0_i32_0 = arith.constant 0 : i32
    return %arg1, %c0_i32 : i32, i32
  }
  func.func @transform_2(%arg0: i32, %arg1: i32) -> (i32, i32) {
    %c0_i32 = arith.constant 0 : i32
    %c0_i32_0 = arith.constant 0 : i32
    %c0_i32_1 = arith.constant 0 : i32
    return %c0_i32, %c0_i32_0 : i32, i32
  }
  func.func @transform_3(%arg0: i32, %arg1: i32) -> (i32, i32) {
    %c0_i32 = arith.constant 0 : i32
    %c0_i32_0 = arith.constant 0 : i32
    return %arg0, %c0_i32 : i32, i32
  }
}

</mosaic_0001>

<bundles_post_ra>
// kernel: tpu_custom_call.1
= control target key start
LH: loop header
LB: loop body
LE: loop exit
PB: predicated region body
PF: predicated region fallthrough
CT: control target
= control target key end

     0   :  { %s682_s12 = smov 0   ;;  %s684_s13 = smov 0   ;;  %s799_s0 = inlined_call_operand.vmem [shape: f32[8,1024], index: 0, kind: input, shape index: {}]   ;;  %s800_s1 = inlined_call_operand.vmem [shape: f32[1024,2], index: 1, kind: input, shape index: {}]   ;;  %s801_s2 = inlined_call_operand.vmem [shape: f32[1,2], index: 2, kind: input, shape index: {}]   ;;  %s802_s3 = inlined_call_operand.vmem [shape: f32[8,2], index: 3, kind: output, shape index: {}]  }
   0x1   :  { %s686_s14 = smov 0  }
   0x2 LB: > { %s22_s15 = sadd.s32 1, %s655_s13  ;;  %p531_p0 = scmp.ge.s32.totalorder %s659_s14, 1  ;;  %s659_s14 = sphi %s686_s14, %s13_s14   ;;  %s655_s13 = sphi %s684_s13, %s804_s13   ;;  %s651_s12 = sphi %s682_s12, %s803_s12  }
   0x3   : > { %p23_p1 = scmp.ge.s32.totalorder %s22_s15, 2  ;;  %p167_p2 = scmp.lt.s32.totalorder %s659_s14, 3 }
   0x5   : > { %s806_s15 = smov (%p23_p1, %s22_s15), 0  ;;  %p168_p3 = pnand %p531_p0, %p167_p2 }
   0x6   : > { %s532_s16 = sshll.u32 (!%p168_p3), %s651_s12, 2  ;;  %s534_s17 = sshll.u32 (!%p168_p3), %s651_s12, 6 }
   0x7   : > { %171 = sbr.rel (%p168_p3) target bundleno = 270 (0x10e), region = 32  ;;  %p202_p4 = scmp.lt.s32.totalorder (!%p168_p3), %s532_s16, 7 }
   0x8   : > { %p210_p5 = scmp.lt.s32.totalorder (!%p168_p3), %s534_s17, 127  ;;  %p536_p6 = scmp.ne.s32.totalorder (!%p168_p3), %s651_s12, 0 }
   0xc   : > { %s808_s16 = smov (!%p202_p4, %s532_s16), 7  ;;  %s810_s17 = smov (!%p210_p5, %s534_s17), 127 }
   0xd   : > { %s533_s18 = sshll.u32 %s808_s16, 3  ;;  %s535_s22 = sshll.u32 %s810_s17, 3 }
   0xe   : > { %s707_s21 = scalar_lea.vmem %s799_s0, %s533_s18  ;;  %s712_s25 = scalar_lea.vmem %s800_s1, %s535_s22 }
   0xf   : > { %222 = sbr.rel (%p536_p6) target bundleno = 22 (0x16), region = 36 }
  0x14   : > { %vm223_vm0 = vcmask 15360   ;;  %v661_v0 = vmov 0.0  }
  0x15   : > { %224 = vst.msk [vmem:[#allocation2] sm:$0xff] %vm223_vm0, %v661_v0 }
  0x16 PF: > { %v261_v1 = vld [vmem:[%s712_s25 + $0xf8] sm:$0xff]  ;;  %v260_v5 = vld [vmem:[%s712_s25 + $0xf0] sm:$0xff]  ;;  %v259_v9 = vld [vmem:[%s712_s25 + $0xe8] sm:$0xff]  ;;  %vm435_vm1 = vcmask 15360   ;;  %p537_p7 = scmp.ne.s32.totalorder %s651_s12, 1 }
  0x17   : > { %v293_v2 = vld [vmem:[%s712_s25 + $0x1f8] sm:$0xff]  ;;  %542 = vmatprep.subr.mxu0 %v261_v1  ;;  %v292_v6 = vld [vmem:[%s712_s25 + $0x1f0] sm:$0xff]  ;;  %v291_v10 = vld [vmem:[%s712_s25 + $0x1e8] sm:$0xff] }
  0x18   : > { %v245_v3 = vld [vmem:[%s712_s25 + $0x78] sm:$0xff]  ;;  %577 = vmatprep.subr.mxu1 %v293_v2  ;;  %v244_v7 = vld [vmem:[%s712_s25 + $0x70] sm:$0xff]  ;;  %v243_v11 = vld [vmem:[%s712_s25 + $0x68] sm:$0xff] }
  0x19   : > { %v277_v4 = vld [vmem:[%s712_s25 + $0x178] sm:$0xff]  ;;  %543 = vmatpush3.msra.mxu0 %v245_v3  ;;  %v276_v8 = vld [vmem:[%s712_s25 + $0x170] sm:$0xff]  ;;  %v275_v12 = vld [vmem:[%s712_s25 + $0x168] sm:$0xff] }
  0x1a   : > { %578 = vmatpush3.msra.mxu1 %v277_v4  ;;  %544 = vmatprep.subr.mxu0 %v260_v5  ;;  %v258_v13 = vld [vmem:[%s712_s25 + $0xe0] sm:$0xff]  ;;  %v257_v17 = vld [vmem:[%s712_s25 + $0xd8] sm:$0xff]  ;;  %v256_v21 = vld [vmem:[%s712_s25 + $0xd0] sm:$0xff] }
  0x1b   : > { %579 = vmatprep.subr.mxu1 %v292_v6  ;;  %545 = vmatpush3.msra.mxu0 %v244_v7  ;;  %v290_v14 = vld [vmem:[%s712_s25 + $0x1e0] sm:$0xff]  ;;  %v289_v18 = vld [vmem:[%s712_s25 + $0x1d8] sm:$0xff]  ;;  %v288_v22 = vld [vmem:[%s712_s25 + $0x1d0] sm:$0xff] }
  0x1c   : > { %580 = vmatpush3.msra.mxu1 %v276_v8  ;;  %546 = vmatprep.subr.mxu0 %v259_v9  ;;  %v242_v15 = vld [vmem:[%s712_s25 + $0x60] sm:$0xff]  ;;  %v241_v19 = vld [vmem:[%s712_s25 + $0x58] sm:$0xff]  ;;  %v240_v23 = vld [vmem:[%s712_s25 + $0x50] sm:$0xff] }
  0x1d   : > { %581 = vmatprep.subr.mxu1 %v291_v10  ;;  %v274_v16 = vld [vmem:[%s712_s25 + $0x160] sm:$0xff]  ;;  %547 = vmatpush3.msra.mxu0 %v243_v11  ;;  %v273_v20 = vld [vmem:[%s712_s25 + $0x158] sm:$0xff]  ;;  %v272_v24 = vld [vmem:[%s712_s25 + $0x150] sm:$0xff] }
  0x1e   : > { %582 = vmatpush3.msra.mxu1 %v275_v12  ;;  %548 = vmatprep.subr.mxu0 %v258_v13  ;;  %v255_v25 = vld [vmem:[%s712_s25 + $0xc8] sm:$0xff]  ;;  %v254_v29 = vld [vmem:[%s712_s25 + $0xc0] sm:$0xff]  ;;  %v253_v33 = vld [vmem:[%s712_s25 + $0xb8] sm:$0xff] }
  0x1f   : > { %583 = vmatprep.subr.mxu1 %v290_v14  ;;  %549 = vmatpush3.msra.mxu0 %v242_v15  ;;  %v287_v26 = vld [vmem:[%s712_s25 + $0x1c8] sm:$0xff]  ;;  %v286_v30 = vld [vmem:[%s712_s25 + $0x1c0] sm:$0xff]  ;;  %v285_v34 = vld [vmem:[%s712_s25 + $0x1b8] sm:$0xff] }
  0x20   : > { %584 = vmatpush3.msra.mxu1 %v274_v16  ;;  %550 = vmatprep.subr.mxu0 %v257_v17  ;;  %v239_v27 = vld [vmem:[%s712_s25 + $0x48] sm:$0xff]  ;;  %v238_v31 = vld [vmem:[%s712_s25 + $0x40] sm:$0xff]  ;;  %v237_v35 = vld [vmem:[%s712_s25 + $0x38] sm:$0xff] }
  0x21   : > { %585 = vmatprep.subr.mxu1 %v289_v18  ;;  %551 = vmatpush3.msra.mxu0 %v241_v19  ;;  %v271_v28 = vld [vmem:[%s712_s25 + $0x148] sm:$0xff]  ;;  %v270_v32 = vld [vmem:[%s712_s25 + $0x140] sm:$0xff]  ;;  %v269_v36 = vld [vmem:[%s712_s25 + $0x138] sm:$0xff] }
  0x22   : > { %586 = vmatpush3.msra.mxu1 %v273_v20  ;;  %552 = vmatprep.subr.mxu0 %v256_v21  ;;  %v252_v37 = vld [vmem:[%s712_s25 + $0xb0] sm:$0xff]  ;;  %v251_v41 = vld [vmem:[%s712_s25 + $0xa8] sm:$0xff]  ;;  %v250_v45 = vld [vmem:[%s712_s25 + $0xa0] sm:$0xff] }
  0x23   : > { %587 = vmatprep.subr.mxu1 %v288_v22  ;;  %553 = vmatpush3.msra.mxu0 %v240_v23  ;;  %v284_v38 = vld [vmem:[%s712_s25 + $0x1b0] sm:$0xff]  ;;  %v283_v42 = vld [vmem:[%s712_s25 + $0x1a8] sm:$0xff]  ;;  %v282_v46 = vld [vmem:[%s712_s25 + $0x1a0] sm:$0xff] }
  0x24   : > { %588 = vmatpush3.msra.mxu1 %v272_v24  ;;  %554 = vmatprep.subr.mxu0 %v255_v25  ;;  %v236_v39 = vld [vmem:[%s712_s25 + $0x30] sm:$0xff]  ;;  %v235_v43 = vld [vmem:[%s712_s25 + $0x28] sm:$0xff]  ;;  %v234_v47 = vld [vmem:[%s712_s25 + $0x20] sm:$0xff] }
  0x25   : > { %589 = vmatprep.subr.mxu1 %v287_v26  ;;  %555 = vmatpush3.msra.mxu0 %v239_v27  ;;  %v268_v40 = vld [vmem:[%s712_s25 + $0x130] sm:$0xff]  ;;  %v267_v44 = vld [vmem:[%s712_s25 + $0x128] sm:$0xff]  ;;  %v266_v48 = vld [vmem:[%s712_s25 + $0x120] sm:$0xff] }
  0x26   : > { %590 = vmatpush3.msra.mxu1 %v271_v28  ;;  %556 = vmatprep.subr.mxu0 %v254_v29  ;;  %v249_v49 = vld [vmem:[%s712_s25 + $0x98] sm:$0xff]  ;;  %v248_v53 = vld [vmem:[%s712_s25 + $0x90] sm:$0xff]  ;;  %v247_v57 = vld [vmem:[%s712_s25 + $0x88] sm:$0xff] }
  0x27   : > { %591 = vmatprep.subr.mxu1 %v286_v30  ;;  %557 = vmatpush3.msra.mxu0 %v238_v31  ;;  %v281_v50 = vld [vmem:[%s712_s25 + $0x198] sm:$0xff]  ;;  %v280_v54 = vld [vmem:[%s712_s25 + $0x190] sm:$0xff]  ;;  %v279_v58 = vld [vmem:[%s712_s25 + $0x188] sm:$0xff] }
  0x28   : > { %592 = vmatpush3.msra.mxu1 %v270_v32  ;;  %558 = vmatprep.subr.mxu0 %v253_v33  ;;  %v233_v51 = vld [vmem:[%s712_s25 + $0x18] sm:$0xff]  ;;  %v232_v55 = vld [vmem:[%s712_s25 + $0x10] sm:$0xff]  ;;  %v231_v59 = vld [vmem:[%s712_s25 + $0x8] sm:$0xff] }
  0x29   : > { %593 = vmatprep.subr.mxu1 %v285_v34  ;;  %559 = vmatpush3.msra.mxu0 %v237_v35  ;;  %v265_v52 = vld [vmem:[%s712_s25 + $0x118] sm:$0xff]  ;;  %v264_v56 = vld [vmem:[%s712_s25 + $0x110] sm:$0xff]  ;;  %v263_v60 = vld [vmem:[%s712_s25 + $0x108] sm:$0xff] }
  0x2a   : > { %594 = vmatpush3.msra.mxu1 %v269_v36  ;;  %560 = vmatprep.subr.mxu0 %v252_v37  ;;  %v246_v61 = vld [vmem:[%s712_s25 + $0x80] sm:$0xff]  ;;  %v227_v0 = vld [vmem:[%s707_s21 + $0x8] sm:$0xff]  ;;  %v229_v2 = vld [vmem:[%s707_s21 + $0x18] sm:$0xff] }
  0x2b   : > { %595 = vmatprep.subr.mxu1 %v284_v38  ;;  %561 = vmatpush3.msra.mxu0 %v236_v39  ;;  %v278_v62 = vld [vmem:[%s712_s25 + $0x180] sm:$0xff]  ;;  %v228_v4 = vld [vmem:[%s707_s21 + $0x10] sm:$0xff] }
  0x2c   : > { %596 = vmatpush3.msra.mxu1 %v268_v40  ;;  %562 = vmatprep.subr.mxu0 %v251_v41  ;;  %v230_v63 = vld [vmem:[%s712_s25] sm:$0xff] }
  0x2d   : > { %597 = vmatprep.subr.mxu1 %v283_v42  ;;  %563 = vmatpush3.msra.mxu0 %v235_v43  ;;  %v262_v1 = vld [vmem:[%s712_s25 + $0x100] sm:$0xff] }
  0x2e   : > { %598 = vmatpush3.msra.mxu1 %v267_v44  ;;  %564 = vmatprep.subr.mxu0 %v250_v45  ;;  %v226_v3 = vld [vmem:[%s707_s21] sm:$0xff] }
  0x2f   : > { %599 = vmatprep.subr.mxu1 %v282_v46  ;;  %565 = vmatpush3.msra.mxu0 %v234_v47  ;;  %v225_v11 = vld [vmem:[#allocation2] sm:$0xff] }
  0x30   : > { %600 = vmatpush3.msra.mxu1 %v266_v48  ;;  %566 = vmatprep.subr.mxu0 %v249_v49 }
  0x31   : > { %601 = vmatprep.subr.mxu1 %v281_v50  ;;  %567 = vmatpush3.msra.mxu0 %v233_v51 }
  0x32   : > { %602 = vmatpush3.msra.mxu1 %v265_v52  ;;  %568 = vmatprep.subr.mxu0 %v248_v53 }
  0x33   : > { %603 = vmatprep.subr.mxu1 %v280_v54  ;;  %569 = vmatpush3.msra.mxu0 %v232_v55 }
  0x34   : > { %604 = vmatpush3.msra.mxu1 %v264_v56  ;;  %570 = vmatprep.subr.mxu0 %v247_v57 }
  0x35   : > { %605 = vmatprep.subr.mxu1 %v279_v58  ;;  %571 = vmatpush3.msra.mxu0 %v231_v59 }
  0x36   : > { %606 = vmatpush3.msra.mxu1 %v263_v60  ;;  %572 = vmatprep.subr.mxu0 %v246_v61 }
  0x37   : > { %607 = vmatprep.subr.mxu1 %v278_v62  ;;  %573 = vmatpush3.msra.mxu0 %v230_v63 }
  0x38   : > { %358 = vmatprep.mubr.f32.mxu0 %v227_v0  ;;  %608 = vmatpush3.msra.mxu1 %v262_v1 }
  0x39   : > { %428 = vmatprep.mubr.f32.mxu1 %v229_v2  ;;  %359 = vmatmul.mubr.f32.vlgmr.msra.gmra.mxu0 %v226_v3 }
  0x3a   : > { %429 = vmatmul.mubr.f32.vlgmr.msra.gmra.mxu1 %v228_v4 }
  0xf9   : > { %v574_v5 = vpop.f32.mrf.mxu0 }
  0xfa   : > { %v609_v6 = vpop.f32.mrf.mxu1 }
  0xfb   : > { %v575_v7 = vpop.f32.mrf.mxu0 }
  0xfc   : > { %v610_v8 = vpop.f32.mrf.mxu1  ;;  %v576_v9 = vadd.f32 %v575_v7, %v574_v5 }
  0xfd   : > { %v611_v10 = vadd.f32 %v610_v8, %v609_v6 }
  0xff   : > { %v431_v12 = vadd.f32 %v611_v10, %v576_v9  ;;  %440 = sbr.rel (%p537_p7) target bundleno = 270 (0x10e), region = 40 }
 0x101   : > { %v434_v13 = vadd.f32 %v431_v12, %v225_v11 }
 0x103   : > { %436 = vst.msk [vmem:[#allocation2] sm:$0xff] %vm435_vm1, %v434_v13 }
 0x104   : > { %v538_v15 = vld [vmem:[%s801_s2] ss:$0 sm:$0xff] }
 0x10a   : > { %v441_v14 = vld [vmem:[#allocation2] sm:$0xff] }
 0x10b   : > { %v449_v16 = vadd.f32 %v538_v15, %v441_v14 }
 0x10d   : > { %450 = vst.msk [vmem:[%s802_s3] sm:$0xff] %vm435_vm1, %v449_v16 }
 0x10e PF: > { %s13_s14 = sadd.s32 1, %s659_s14   ;;  %s803_s12 = smov %s655_s13 }
 0x10f   : > { %p10_p8 = scmp.ge.s32.totalorder %s13_s14, 4   ;;  %s804_s13 = smov %s806_s15 }
 0x111   :  { %12 = sbr.rel (!%p10_p8) target bundleno = 2 (0x2), region = 73 }

</bundles_post_ra>
